<compile_context>
chip_gen: v5e
topology: v5e:2x2
jax: 0.10.0
libtpu: 0.0.40
codegen_flags: <defaults>
</compile_context>

<pallas_src>
import functools

import jax
import jax.numpy as jnp
from jax.experimental import pallas as pl
from jax.experimental.pallas import tpu as pltpu

_IGNORE_INDEX = -100  # PyTorch default


def _round_up(x: int, m: int) -> int:
    return (x + m - 1) // m * m


@functools.lru_cache(maxsize=1)
def _vmem_capacity_bytes() -> int:
    """Physical VMEM per TensorCore; conservative fallback if query fails."""
    try:
        info = pltpu.get_tpu_info()
        cap = getattr(info, "vmem_capacity_bytes", None)
        if cap:
            return int(cap)
    except Exception:
        pass
    return 64 * 1024 * 1024  # conservative default (v7x-sized)


def _choose_row_tile(n_rows: int, n_classes: int, itemsize: int,
                     requested: int | None, vmem_cap: int) -> int:
    """Row-tile size: as large as ~1/8 of physical VMEM per input buffer
    (double-buffered by the pipeline), rounded to the dtype-native sublane
    tile, never larger than the (rounded-up) batch itself."""
    sublane = max(8, 32 // max(1, itemsize))      # f32: 8, bf16: 16, int8: 32
    if requested is not None:
        tn = _round_up(max(int(requested), 1), sublane)
    else:
        budget = max(vmem_cap // 8, 2 * 1024 * 1024)   # bytes per input buffer
        rows_fit = budget // max(1, n_classes * itemsize)
        tn = max(sublane, rows_fit // sublane * sublane)
    tn = min(tn, _round_up(n_rows, sublane))
    return max(tn, sublane)


def _cross_entropy_kernel(logits_ref, targets_ref, loss_ref, valid_ref):
    # logits_ref:  VMEM (TN, C) input dtype
    # targets_ref: VMEM (TN, 1) int32
    # loss_ref:    VMEM (TN, 1) f32   -- per-row loss (0 where ignored)
    # valid_ref:   VMEM (TN, 1) f32   -- 1.0 where target != ignore_index
    x = logits_ref[...]                       # (TN, C) native dtype
    tgt = targets_ref[...]                    # (TN, 1) int32
    tn, c = x.shape

    # Numerically stable logsumexp; shift in f32 (bf16 -> f32 is exact).
    xf = x.astype(jnp.float32)                                    # (TN, C)
    row_max = jnp.max(xf, axis=-1, keepdims=True)                 # (TN, 1)
    shifted = xf - row_max                                        # (TN, C)
    sumexp = jnp.sum(jnp.exp(shifted), axis=-1, keepdims=True)    # (TN, 1)

    # Gather the shifted logit at the target class via one-hot compare +
    # lane reduce (no dynamic gather on TPU).  Gathering from `shifted`
    # lets the row_max terms cancel: loss = log(sumexp) - shifted[target].
    class_ids = jax.lax.broadcasted_iota(jnp.int32, (tn, c), 1)   # (TN, C)
    tgt_shifted = jnp.sum(
        jnp.where(class_ids == tgt, shifted, 0.0),
        axis=-1, keepdims=True)                                   # (TN, 1)

    per_row = jnp.log(sumexp) - tgt_shifted                       # (TN, 1)

    valid = tgt != _IGNORE_INDEX                                  # (TN, 1)
    loss_ref[...] = jnp.where(valid, per_row, 0.0)
    valid_ref[...] = valid.astype(jnp.float32)


@functools.partial(jax.jit, static_argnames=("reduction", "row_tile"))
def cross_entropy_loss(logits: jax.Array, targets: jax.Array,
                       *, reduction: str = "mean",
                       row_tile: int | None = None) -> jax.Array:
    """F.cross_entropy(logits, targets, weight=None, reduction=reduction)."""
    n, c = logits.shape
    itemsize = logits.dtype.itemsize
    vmem_cap = _vmem_capacity_bytes()
    tn = _choose_row_tile(n, c, itemsize, row_tile, vmem_cap)
    grid_n = pl.cdiv(n, tn)

    targets2 = targets.astype(jnp.int32).reshape(n, 1)

    loss_rows, valid_rows = pl.pallas_call(
        _cross_entropy_kernel,
        out_shape=(jax.ShapeDtypeStruct((n, 1), jnp.float32),
                   jax.ShapeDtypeStruct((n, 1), jnp.float32)),
        grid=(grid_n,),
        in_specs=[
            pl.BlockSpec((tn, c), lambda i: (i, 0)),
            pl.BlockSpec((tn, 1), lambda i: (i, 0)),
        ],
        out_specs=(
            pl.BlockSpec((tn, 1), lambda i: (i, 0)),
            pl.BlockSpec((tn, 1), lambda i: (i, 0)),
        ),
        compiler_params=pltpu.CompilerParams(
            dimension_semantics=("parallel",),        # independent tiles
            vmem_limit_bytes=int(vmem_cap * 3 // 4),  # 48 MiB v7x / 96 MiB v5e-v6e
        ),
        cost_estimate=pl.CostEstimate(
            flops=6 * n * c,
            transcendentals=n * c,
            bytes_accessed=n * c * itemsize + 12 * n,
        ),
    )(logits, targets2)

    loss_rows = loss_rows[:, 0]
    valid_rows = valid_rows[:, 0]

    if reduction == "mean":
        # NaN if every target is ignore_index -- matches PyTorch.
        return (jnp.sum(loss_rows) / jnp.sum(valid_rows)).astype(logits.dtype)
    if reduction == "sum":
        return jnp.sum(loss_rows).astype(logits.dtype)
    # 'none': per-element loss, 0 where ignored (matches PyTorch).
    return loss_rows.astype(logits.dtype)


class CrossEntropyLoss:
    """Mirror of the PyTorch module (weight unsupported -> TODO above)."""

    def __init__(self, weight=None, reduction="mean"):
        assert weight is None, "per-class weight not implemented"
        self.reduction = reduction

    def __call__(self, logits: jax.Array, targets: jax.Array) -> jax.Array:
        return cross_entropy_loss(logits, targets, reduction=self.reduction)


if __name__ == "__main__":
    key = jax.random.PRNGKey(0)
    k1, k2, k3, k4 = jax.random.split(key, 4)

    # --- test 1: small, single tile, all targets valid ----------------------
    N, C = 8, 32
    logits = jax.random.normal(k1, (N, C), dtype=jnp.float32)
    targets = jax.random.randint(k2, (N,), 0, C, dtype=jnp.int32)

    loss = CrossEntropyLoss()(logits, targets)
    jax.block_until_ready(loss)

    ref = jnp.mean(
        jax.nn.logsumexp(logits, axis=-1)
        - jnp.take_along_axis(logits, targets[:, None], axis=-1)[:, 0])
    assert jnp.allclose(loss, ref, atol=1e-5, rtol=1e-5), (loss, ref)

    # --- test 2: multi-tile + ragged last block + ignore_index=-100 ---------
    N2, C2 = 20, 32
    logits2 = jax.random.normal(k3, (N2, C2), dtype=jnp.float32)
    targets2 = jax.random.randint(k4, (N2,), 0, C2, dtype=jnp.int32)
    targets2 = targets2.at[3].set(_IGNORE_INDEX)

    loss2 = cross_entropy_loss(logits2, targets2, row_tile=8)
    jax.block_until_ready(loss2)

    per2 = (jax.nn.logsumexp(logits2, axis=-1)
            - jnp.take_along_axis(
                logits2, jnp.clip(targets2, 0, C2 - 1)[:, None], axis=-1)[:, 0])
    mask2 = targets2 != _IGNORE_INDEX
    ref2 = jnp.sum(jnp.where(mask2, per2, 0.0)) / jnp.sum(mask2)
    assert jnp.allclose(loss2, ref2, atol=1e-5, rtol=1e-5), (loss2, ref2)

    print("KERNEL_OK")
</pallas_src>

<mosaic_0001>
module attributes {stable_mosaic.version = 11 : i64} {
  func.func @_cross_entropy_kernel(%arg0: i32, %arg1: memref<8x32xf32, #tpu.memory_space<vmem>>, %arg2: memref<8x1xi32, #tpu.memory_space<vmem>>, %arg3: memref<8x1xf32, #tpu.memory_space<vmem>>, %arg4: memref<8x1xf32, #tpu.memory_space<vmem>>) attributes {dimension_semantics = [#tpu.dimension_semantics<parallel>], iteration_bounds = array<i64: 1>, scalar_prefetch = 0 : i64, scratch_operands = 0 : i64, tpu.core_type = #tpu.core_type<tc>, window_params = [{transform_indices = @transform_0, window_bounds = array<i64: 8, 32>}, {transform_indices = @transform_1, window_bounds = array<i64: 8, 1>}, {transform_indices = @transform_2, window_bounds = array<i64: 8, 1>}, {transform_indices = @transform_3, window_bounds = array<i64: 8, 1>}]} {
    %c0 = arith.constant 0 : index
    %c0_0 = arith.constant 0 : index
    %0 = vector.load %arg1[%c0, %c0_0] : memref<8x32xf32, #tpu.memory_space<vmem>>, vector<8x32xf32>
    %c0_1 = arith.constant 0 : index
    %c0_2 = arith.constant 0 : index
    %1 = vector.load %arg2[%c0_1, %c0_2] : memref<8x1xi32, #tpu.memory_space<vmem>>, vector<8x1xi32>
    %cst = arith.constant dense<0xFF800000> : vector<8xf32>
    %2 = vector.multi_reduction <maximumf>, %0, %cst [1] : vector<8x32xf32> to vector<8xf32>
    %3 = vector.shape_cast %2 : vector<8xf32> to vector<8x1xf32>
    %4 = vector.broadcast %3 : vector<8x1xf32> to vector<8x32xf32>
    %5 = arith.subf %0, %4 : vector<8x32xf32>
    %6 = math.exp %5 : vector<8x32xf32>
    %cst_3 = arith.constant dense<0.000000e+00> : vector<8xf32>
    %7 = vector.multi_reduction <add>, %6, %cst_3 [1] : vector<8x32xf32> to vector<8xf32>
    %8 = vector.shape_cast %7 : vector<8xf32> to vector<8x1xf32>
    %9 = tpu.iota {dimensions = array<i32: 1>} : vector<8x32xi32>
    %10 = vector.broadcast %1 : vector<8x1xi32> to vector<8x32xi32>
    %11 = arith.cmpi eq, %9, %10 : vector<8x32xi32>
    %cst_4 = arith.constant 0.000000e+00 : f32
    %12 = vector.broadcast %cst_4 : f32 to vector<8x32xf32>
    %13 = arith.select %11, %5, %12 : vector<8x32xi1>, vector<8x32xf32>
    %cst_5 = arith.constant dense<0.000000e+00> : vector<8xf32>
    %14 = vector.multi_reduction <add>, %13, %cst_5 [1] : vector<8x32xf32> to vector<8xf32>
    %15 = vector.shape_cast %14 : vector<8xf32> to vector<8x1xf32>
    %16 = math.log %8 : vector<8x1xf32>
    %17 = arith.subf %16, %15 : vector<8x1xf32>
    %c-100_i32 = arith.constant -100 : i32
    %18 = vector.broadcast %c-100_i32 : i32 to vector<8x1xi32>
    %19 = arith.cmpi ne, %1, %18 : vector<8x1xi32>
    %cst_6 = arith.constant 0.000000e+00 : f32
    %20 = vector.broadcast %cst_6 : f32 to vector<8x1xf32>
    %21 = arith.select %19, %17, %20 : vector<8x1xi1>, vector<8x1xf32>
    %c0_7 = arith.constant 0 : index
    %c0_8 = arith.constant 0 : index
    %22 = vector.load %arg3[%c0_7, %c0_8] : memref<8x1xf32, #tpu.memory_space<vmem>>, vector<8x1xf32>
    tpu.vector_store %arg3[%c0_7, %c0_8], %21 {strides = array<i32>} : memref<8x1xf32, #tpu.memory_space<vmem>>, vector<8x1xf32>,
    %23 = arith.extui %19 : vector<8x1xi1> to vector<8x1xi32>
    %24 = arith.sitofp %23 : vector<8x1xi32> to vector<8x1xf32>
    %c0_9 = arith.constant 0 : index
    %c0_10 = arith.constant 0 : index
    %25 = vector.load %arg4[%c0_9, %c0_10] : memref<8x1xf32, #tpu.memory_space<vmem>>, vector<8x1xf32>
    tpu.vector_store %arg4[%c0_9, %c0_10], %24 {strides = array<i32>} : memref<8x1xf32, #tpu.memory_space<vmem>>, vector<8x1xf32>,
    return
  }
  func.func @transform_0(%arg0: i32) -> (i32, i32) {
    %c0_i32 = arith.constant 0 : i32
    %c0_i32_0 = arith.constant 0 : i32
    return %arg0, %c0_i32 : i32, i32
  }
  func.func @transform_1(%arg0: i32) -> (i32, i32) {
    %c0_i32 = arith.constant 0 : i32
    %c0_i32_0 = arith.constant 0 : i32
    return %arg0, %c0_i32 : i32, i32
  }
  func.func @transform_2(%arg0: i32) -> (i32, i32) {
    %c0_i32 = arith.constant 0 : i32
    %c0_i32_0 = arith.constant 0 : i32
    return %arg0, %c0_i32 : i32, i32
  }
  func.func @transform_3(%arg0: i32) -> (i32, i32) {
    %c0_i32 = arith.constant 0 : i32
    %c0_i32_0 = arith.constant 0 : i32
    return %arg0, %c0_i32 : i32, i32
  }
}

</mosaic_0001>

<bundles_post_ra>
// kernel: cross_entropy_loss.1
= control target key start
LH: loop header
LB: loop body
LE: loop exit
PB: predicated region body
PF: predicated region fallthrough
CT: control target
= control target key end

     0   :  { %vm15_vm0 = vcmask 261120   ;;  %v61_v1 = vmov 0   ;;  %vm40_vm1 = vcmask 7168   ;;  %v62_v4 = vmov 0.0   ;;  %s102_s0 = inlined_call_operand.vmem [shape: f32[8,32], index: 0, kind: input, shape index: {}]   ;;  %s103_s1 = inlined_call_operand.vmem [shape: s32[8,1], index: 1, kind: input, shape index: {}]   ;;  %s104_s3 = inlined_call_operand.vmem [shape: f32[8,1], index: 3, kind: output, shape index: {1}]   ;;  %s105_s2 = inlined_call_operand.vmem [shape: f32[8,1], index: 2, kind: output, shape index: {0}]  }
   0x1   :  { %v13_v0 = vld [vmem:[%s102_s0] sm:$0xff]  ;;  %56 = vset.pattern.permute.xlu0 %v61_v1  ;;  %v25_v11 = vlaneseq }
   0x2   :  { %v14_v2 = vld [vmem:[%s103_s1] sm:$0xff]  ;;  %v16_v3 = vsel %vm15_vm0, %v13_v0, -inf }
   0x3   :  { %vm38_vm2 = vcmp.ne.s32.totalorder %v14_v2, 4294967196  ;;  %17 = vmax.xlane.f32.xlu0 %v16_v3  ;;  %v26_v12 = vand.u32 127, %v25_v11 }
   0x4   :  { %v53_v5 = vsel %vm38_vm2, 1.0, %v62_v4 }
   0x5   :  { %44 = vst.msk [vmem:[%s104_s3] sm:$0xff] %vm40_vm1, %v53_v5 }
  0x17   :  { %28 = vperm.xlu0 %56, %v14_v2  }
  0x76   :  { %v18_v6 = vpop.xlane.xlu0 %17 }
  0x77   :  { %v19_v7 = vsub.f32 %v13_v0, %v18_v6 }
  0x79   :  { %v20_v8 = vmul.f32 1.442695, %v19_v7 }
  0x7b   :  { %57 = vpow2.f32 %v20_v8 }
  0x81   :  { %v58_v9 = vpop.eup %57 }
  0x82   :  { %v22_v10 = vsel %vm15_vm0, %v58_v9, 0.0 }
  0x83   :  { %23 = vadd.xlane.f32.xlu1 %v22_v10 }
  0x89   :  { %v29_v13 = vpop.permute.xlu0 %28 }
  0x8a   :  { %vm30_vm3 = vcmp.eq.s32.totalorder %v26_v12, %v29_v13 }
  0x8b   :  { %v31_v14 = vsel %vm30_vm3, %v19_v7, 0.0 }
  0x8c   :  { %v32_v15 = vsel %vm15_vm0, %v31_v14, 0.0 }
  0x8d   :  { %33 = vadd.xlane.f32.xlu1 %v32_v15 }
  0xf6   :  { %v24_v16 = vpop.xlane.xlu1 %23 }
  0xf7   :  { %59 = vlog2.f32 %v24_v16 }
  0xfd   :  { %v60_v17 = vpop.eup %59 }
  0xfe   :  { %v36_v18 = vmul.f32 0.6931472, %v60_v17 }
 0x100   :  { %v34_v19 = vpop.xlane.xlu1 %33 }
 0x101   :  { %v37_v20 = vsub.f32 %v36_v18, %v34_v19 }
 0x103   :  { %v39_v21 = vsel %vm38_vm2, %v37_v20, 0.0 }
 0x104   :  { %41 = vst.msk [vmem:[%s105_s2] sm:$0xff] %vm40_vm1, %v39_v21 }

</bundles_post_ra>
